<compile_context>
chip_gen: v6e
topology: v6e:2x2x1
jax: 0.10.0
libtpu: 0.0.40
codegen_flags: <defaults>
</compile_context>

<pallas_src>
import jax
import jax.numpy as jnp
from jax import lax
from jax.experimental import pallas as pl
from jax.experimental.pallas import tpu as pltpu

_LN2 = 0.6931471805599453
_CHUNK = 8  # rows per inner step == one f32 sublane group -> chunk stays in vregs


def _round_up(x: int, m: int) -> int:
    return (x + m - 1) // m * m


def _pick_lanes(total: int, last_dim: int) -> int:
    """Largest lane-dense width (multiple of 128) that divides total (zero-copy)."""
    divisors = [c for c in (512, 384, 256, 128) if total % c == 0]
    for c in divisors:
        if total // c >= 8:          # prefer >= one full sublane group of rows
            return c
    if divisors:
        return divisors[0]
    return last_dim                  # zero-copy fallback (masked lanes, rare)


def _make_jsd_kernel(tile_rows, lanes, out_lanes, rows_total, needs_row_mask, unroll):
    n_chunks = tile_rows // _CHUNK
    n_lane_groups = lanes // out_lanes

    def kernel(p_ref, q_ref, o_ref):
        block_row0 = pl.program_id(0) * tile_rows
        if needs_row_mask:
            # Hoisted out of the loop (JAX does not CSE broadcast/iota in loops).
            sub_iota = lax.broadcasted_iota(jnp.int32, (_CHUNK, lanes), 0)

        def chunk(g, acc):
            r0 = pl.multiple_of(g * _CHUNK, _CHUNK)
            p = p_ref[pl.ds(r0, _CHUNK), :].astype(jnp.float32)
            q = q_ref[pl.ds(r0, _CHUNK), :].astype(jnp.float32)
            if needs_row_mask:
                # Rows past the real extent (ragged last block) -> p = q = 1,
                # which contributes exactly 0 to the sum.
                valid = (block_row0 + r0 + sub_iota) < rows_total
                p = jnp.where(valid, p, 1.0)
                q = jnp.where(valid, q, 1.0)
            s = p + q
            # x*log(x) with the 0*log(0) -> 0 convention (intended JSD limit).
            term = (jnp.where(p > 0, p * jnp.log(p), 0.0)
                    + jnp.where(q > 0, q * jnp.log(q), 0.0)
                    - jnp.where(s > 0, s * (jnp.log(s) - jnp.float32(_LN2)), 0.0))
            # Lane fold via static 128-aligned slices: (8, L) -> (8, out_lanes).
            out = term[:, 0:out_lanes]
            for j in range(1, n_lane_groups):
                out = out + term[:, j * out_lanes:(j + 1) * out_lanes]
            return acc + out

        acc = lax.fori_loop(0, n_chunks, chunk,
                            jnp.zeros((_CHUNK, out_lanes), jnp.float32),
                            unroll=unroll)
        o_ref[...] = acc

    return kernel


def jensen_shannon_divergence(
    p: jax.Array,
    q: jax.Array,
    *,
    tile_bytes: int = 4 * 1024 * 1024,          # f32 bytes per input block (v7x-safe)
    vmem_limit_bytes: int = 48 * 1024 * 1024,
) -> jax.Array:
    """JSD exactly matching the PyTorch module's forward (batchmean over N = total / last_dim)."""
    assert p.shape == q.shape, "p and q must have the same shape"
    assert p.ndim >= 1

    total = int(p.size)
    last_dim = int(p.shape[-1])
    n_rows = total // last_dim          # batchmean divisor, as in the PyTorch module

    lanes = _pick_lanes(total, last_dim)
    rows = total // lanes               # exact by construction -> zero-copy reshape
    p2 = p.reshape(rows, lanes)
    q2 = q.reshape(rows, lanes)

    # Tile sizing: ~tile_bytes of f32 per input block; cap at ~rows/2 so the
    # "parallel" grid has >= 2 blocks (both v7x TensorCores get work).
    budget_rows = max(_CHUNK, (tile_bytes // (lanes * 4)) // _CHUNK * _CHUNK)
    half_rows = _round_up(-(-rows // 2), _CHUNK)
    tile_rows = max(_CHUNK, min(budget_rows, half_rows))
    num_blocks = -(-rows // tile_rows)
    needs_row_mask = (rows % tile_rows) != 0

    out_lanes = 128 if lanes % 128 == 0 else lanes
    n_chunks = tile_rows // _CHUNK
    unroll = next(u for u in (8, 4, 2, 1) if n_chunks % u == 0)

    kernel = _make_jsd_kernel(tile_rows, lanes, out_lanes, rows, needs_row_mask, unroll)

    partials = pl.pallas_call(
        kernel,
        out_shape=jax.ShapeDtypeStruct((num_blocks * _CHUNK, out_lanes), jnp.float32),
        grid_spec=pltpu.PrefetchScalarGridSpec(
            num_scalar_prefetch=0,
            grid=(num_blocks,),
            in_specs=[
                pl.BlockSpec((tile_rows, lanes), lambda i: (i, 0)),
                pl.BlockSpec((tile_rows, lanes), lambda i: (i, 0)),
            ],
            out_specs=pl.BlockSpec((_CHUNK, out_lanes), lambda i: (i, 0)),
        ),
        compiler_params=pltpu.CompilerParams(
            dimension_semantics=("parallel",),   # independent per-block partials
            vmem_limit_bytes=vmem_limit_bytes,
        ),
    )(p2, q2)

    # Tiny final cross-lane reduction + batchmean scale outside the kernel.
    return 0.5 * jnp.sum(partials) / jnp.float32(n_rows)


def _jsd_reference(p: jax.Array, q: jax.Array) -> jax.Array:
    """Pure-JAX reference mirroring the PyTorch module."""
    p2 = p.reshape(-1, p.shape[-1]).astype(jnp.float32)
    q2 = q.reshape(-1, q.shape[-1]).astype(jnp.float32)
    n = p2.shape[0]
    m = jnp.log(0.5 * (p2 + q2))
    kl_pm = jnp.sum(p2 * (jnp.log(p2) - m)) / n
    kl_qm = jnp.sum(q2 * (jnp.log(q2) - m)) / n
    return 0.5 * (kl_pm + kl_qm)


if __name__ == "__main__":
    key = jax.random.PRNGKey(0)
    k1, k2, k3, k4 = jax.random.split(key, 4)

    # NCHW logits -> probabilities via softmax over the last axis (finite logs).
    shape = (2, 4, 16, 16)
    p = jax.nn.softmax(jax.random.normal(k1, shape, dtype=jnp.float32), axis=-1)
    q = jax.nn.softmax(jax.random.normal(k2, shape, dtype=jnp.float32), axis=-1)

    jsd = jax.jit(jensen_shannon_divergence)(p, q)
    jsd = jax.block_until_ready(jsd)
    ref = _jsd_reference(p, q)
    assert jnp.allclose(jsd, ref, rtol=1e-5, atol=1e-6), (jsd, ref)

    # Second case: exercises the ragged-last-block in-kernel masking path.
    shape2 = (4, 6, 16, 16)
    p2 = jax.nn.softmax(jax.random.normal(k3, shape2, dtype=jnp.float32), axis=-1)
    q2 = jax.nn.softmax(jax.random.normal(k4, shape2, dtype=jnp.float32), axis=-1)
    jsd2 = jax.jit(jensen_shannon_divergence)(p2, q2)
    jsd2 = jax.block_until_ready(jsd2)
    ref2 = _jsd_reference(p2, q2)
    assert jnp.allclose(jsd2, ref2, rtol=1e-5, atol=1e-6), (jsd2, ref2)

    print("KERNEL_OK")
</pallas_src>

<mosaic_0001>
module attributes {stable_mosaic.version = 11 : i64} {
  func.func @kernel(%arg0: i32, %arg1: memref<8x256xf32, #tpu.memory_space<vmem>>, %arg2: memref<8x256xf32, #tpu.memory_space<vmem>>, %arg3: memref<8x128xf32, #tpu.memory_space<vmem>>) attributes {dimension_semantics = [#tpu.dimension_semantics<parallel>], iteration_bounds = array<i64: 1>, scalar_prefetch = 0 : i64, scratch_operands = 0 : i64, tpu.core_type = #tpu.core_type<tc>, window_params = [{transform_indices = @transform_0, window_bounds = array<i64: 8, 256>}, {transform_indices = @transform_1, window_bounds = array<i64: 8, 256>}, {transform_indices = @transform_2, window_bounds = array<i64: 8, 128>}]} {
    %cst = arith.constant 0.000000e+00 : f32
    %0 = vector.broadcast %cst : f32 to vector<8x128xf32>
    %c0_i32 = arith.constant 0 : i32
    %c8_i32 = arith.constant 8 : i32
    %1 = arith.muli %c0_i32, %c8_i32 : i32
    %2 = tpu.assume_multiple %1, 8 : i32
    %3 = arith.index_cast %2 : i32 to index
    %c0 = arith.constant 0 : index
    %4 = vector.load %arg1[%3, %c0] : memref<8x256xf32, #tpu.memory_space<vmem>>, vector<8x256xf32>
    %5 = arith.index_cast %2 : i32 to index
    %c0_0 = arith.constant 0 : index
    %6 = vector.load %arg2[%5, %c0_0] : memref<8x256xf32, #tpu.memory_space<vmem>>, vector<8x256xf32>
    %7 = arith.addf %4, %6 : vector<8x256xf32>
    %cst_1 = arith.constant 0.000000e+00 : f32
    %8 = vector.broadcast %cst_1 : f32 to vector<8x256xf32>
    %9 = arith.cmpf ogt, %4, %8 : vector<8x256xf32>
    %10 = math.log %4 : vector<8x256xf32>
    %11 = arith.mulf %4, %10 : vector<8x256xf32>
    %cst_2 = arith.constant 0.000000e+00 : f32
    %12 = vector.broadcast %cst_2 : f32 to vector<8x256xf32>
    %13 = arith.select %9, %11, %12 : vector<8x256xi1>, vector<8x256xf32>
    %cst_3 = arith.constant 0.000000e+00 : f32
    %14 = vector.broadcast %cst_3 : f32 to vector<8x256xf32>
    %15 = arith.cmpf ogt, %6, %14 : vector<8x256xf32>
    %16 = math.log %6 : vector<8x256xf32>
    %17 = arith.mulf %6, %16 : vector<8x256xf32>
    %cst_4 = arith.constant 0.000000e+00 : f32
    %18 = vector.broadcast %cst_4 : f32 to vector<8x256xf32>
    %19 = arith.select %15, %17, %18 : vector<8x256xi1>, vector<8x256xf32>
    %20 = arith.addf %13, %19 : vector<8x256xf32>
    %cst_5 = arith.constant 0.000000e+00 : f32
    %21 = vector.broadcast %cst_5 : f32 to vector<8x256xf32>
    %22 = arith.cmpf ogt, %7, %21 : vector<8x256xf32>
    %23 = math.log %7 : vector<8x256xf32>
    %cst_6 = arith.constant 0.693147182 : f32
    %24 = vector.broadcast %cst_6 : f32 to vector<8x256xf32>
    %25 = arith.subf %23, %24 : vector<8x256xf32>
    %26 = arith.mulf %7, %25 : vector<8x256xf32>
    %cst_7 = arith.constant 0.000000e+00 : f32
    %27 = vector.broadcast %cst_7 : f32 to vector<8x256xf32>
    %28 = arith.select %22, %26, %27 : vector<8x256xi1>, vector<8x256xf32>
    %29 = arith.subf %20, %28 : vector<8x256xf32>
    %30 = vector.extract_strided_slice %29 {offsets = [0, 0], sizes = [8, 128], strides = [1, 1]} : vector<8x256xf32> to vector<8x128xf32>
    %31 = vector.extract_strided_slice %29 {offsets = [0, 128], sizes = [8, 128], strides = [1, 1]} : vector<8x256xf32> to vector<8x128xf32>
    %32 = arith.addf %30, %31 : vector<8x128xf32>
    %33 = arith.addf %0, %32 : vector<8x128xf32>
    %c1_i32 = arith.constant 1 : i32
    %c0_8 = arith.constant 0 : index
    %c0_9 = arith.constant 0 : index
    %34 = vector.load %arg3[%c0_8, %c0_9] : memref<8x128xf32, #tpu.memory_space<vmem>>, vector<8x128xf32>
    tpu.vector_store %arg3[%c0_8, %c0_9], %33 {strides = array<i32>} : memref<8x128xf32, #tpu.memory_space<vmem>>, vector<8x128xf32>,
    return
  }
  func.func @transform_0(%arg0: i32) -> (i32, i32) {
    %c0_i32 = arith.constant 0 : i32
    %c0_i32_0 = arith.constant 0 : i32
    return %arg0, %c0_i32 : i32, i32
  }
  func.func @transform_1(%arg0: i32) -> (i32, i32) {
    %c0_i32 = arith.constant 0 : i32
    %c0_i32_0 = arith.constant 0 : i32
    return %arg0, %c0_i32 : i32, i32
  }
  func.func @transform_2(%arg0: i32) -> (i32, i32) {
    %c0_i32 = arith.constant 0 : i32
    %c0_i32_0 = arith.constant 0 : i32
    return %arg0, %c0_i32 : i32, i32
  }
}

</mosaic_0001>

<bundles_post_ra>
// kernel: jensen_shannon_divergence.1
= control target key start
LH: loop header
LB: loop body
LE: loop exit
PB: predicated region body
PF: predicated region fallthrough
CT: control target
= control target key end

     0   :  { %s109_s0 = inlined_call_operand.vmem [shape: f32[8,256], index: 0, kind: input, shape index: {}]   ;;  %s110_s1 = inlined_call_operand.vmem [shape: f32[8,256], index: 1, kind: input, shape index: {}]   ;;  %s111_s2 = inlined_call_operand.vmem [shape: f32[8,128], index: 2, kind: output, shape index: {}]  }
   0x1   :  { %v14_v0 = vld [vmem:[%s109_s0] sm:$0xff]  ;;  %v15_v1 = vld [vmem:[%s109_s0 + $0x8] sm:$0xff] }
   0x2   :  { %v18_v2 = vld [vmem:[%s110_s1] sm:$0xff]  ;;  %v19_v3 = vld [vmem:[%s110_s1 + $0x8] sm:$0xff]  ;;  %67 = vlog2.f32 %v14_v0  ;;  %vm22_vm0 = vcmp.gt.f32.partialorder %v14_v0, 0.0  ;;  %vm23_vm1 = vcmp.gt.f32.partialorder %v15_v1, 0.0 }
   0x3   :  { %v20_v4 = vadd.f32 %v18_v2, %v14_v0  ;;  %v21_v5 = vadd.f32 %v19_v3, %v15_v1  ;;  %69 = vlog2.f32 %v15_v1  ;;  %vm32_vm2 = vcmp.gt.f32.partialorder %v18_v2, 0.0 }
   0x4   :  { %71 = vlog2.f32 %v18_v2  ;;  %vm33_vm3 = vcmp.gt.f32.partialorder %v19_v3, 0.0 }
   0x5   :  { %73 = vlog2.f32 %v19_v3  ;;  %vm44_vm4 = vcmp.gt.f32.partialorder %v20_v4, 0.0  ;;  %vm45_vm5 = vcmp.gt.f32.partialorder %v21_v5, 0.0 }
   0x6   :  { %75 = vlog2.f32 %v20_v4 }
   0x7   :  { %77 = vlog2.f32 %v21_v5 }
   0xf   :  { %v68_v6 = vpop.eup %67 }
  0x10   :  { %v70_v7 = vpop.eup %69  ;;  %v25_v8 = vmul.f32 0.6931472, %v68_v6 }
  0x11   :  { %v72_v9 = vpop.eup %71  ;;  %v27_v10 = vmul.f32 0.6931472, %v70_v7 }
  0x12   :  { %v74_v11 = vpop.eup %73  ;;  %v28_v12 = vmul.f32 %v25_v8, %v14_v0  ;;  %v35_v13 = vmul.f32 0.6931472, %v72_v9 }
  0x13   :  { %v76_v14 = vpop.eup %75  ;;  %v29_v15 = vmul.f32 %v27_v10, %v15_v1  ;;  %v37_v16 = vmul.f32 0.6931472, %v74_v11 }
  0x14   :  { %v78_v17 = vpop.eup %77  ;;  %v30_v18 = vsel %vm22_vm0, %v28_v12, 0.0  ;;  %v38_v19 = vmul.f32 %v35_v13, %v18_v2  ;;  %v47_v20 = vmul.f32 0.6931472, %v76_v14 }
  0x15   :  { %v31_v21 = vsel %vm23_vm1, %v29_v15, 0.0  ;;  %v39_v22 = vmul.f32 %v37_v16, %v19_v3  ;;  %v49_v23 = vmul.f32 0.6931472, %v78_v17 }
  0x16   :  { %v40_v24 = vsel %vm32_vm2, %v38_v19, 0.0  ;;  %v65_v25 = vadd.f32 -0.6931472, %v47_v20 }
  0x17   :  { %v41_v26 = vsel %vm33_vm3, %v39_v22, 0.0  ;;  %v42_v27 = vadd.f32 %v40_v24, %v30_v18  ;;  %v66_v28 = vadd.f32 -0.6931472, %v49_v23 }
  0x18   :  { %v43_v29 = vadd.f32 %v41_v26, %v31_v21  ;;  %v52_v30 = vmul.f32 %v65_v25, %v20_v4 }
  0x19   :  { %v53_v31 = vmul.f32 %v66_v28, %v21_v5 }
  0x1a   :  { %v54_v32 = vsel %vm44_vm4, %v52_v30, 0.0 }
  0x1b   :  { %v55_v33 = vsel %vm45_vm5, %v53_v31, 0.0  ;;  %v56_v34 = vsub.f32 %v42_v27, %v54_v32 }
  0x1c   :  { %v57_v35 = vsub.f32 %v43_v29, %v55_v33 }
  0x1e   :  { %v58_v36 = vadd.f32 %v57_v35, %v56_v34 }
  0x20   :  { %60 = vst [vmem:[%s111_s2] sm:$0xff] %v58_v36 }

</bundles_post_ra>
